<compile_context>
chip_gen: v7x
topology: tpu7x:2x2x1
jax: 0.10.0
libtpu: 0.0.40
codegen_flags: <defaults>
</compile_context>

<pallas_src>
from functools import partial

import jax
import jax.numpy as jnp
from jax.experimental import pallas as pl
from jax.experimental.pallas import tpu as pltpu


def _pick_row_tile(H_out, W_out):
    """Smallest divisor of H_out whose tile gives >=128 matmul rows (8-aligned)."""
    chosen = H_out
    for th in range(1, H_out + 1):
        if H_out % th != 0:
            continue
        if (th * W_out) % 8 != 0 and th != H_out:
            continue
        chosen = th
        if th * W_out >= 128:
            break
    return chosen


def conv_bn_act_kernel(x_ref, w_ref, b_ref, o_ref, *, K, stride, TH, W_out, C_in):
    # x_ref : (1, Hp, Wp, Cin)          padded bf16 image for one batch element
    # w_ref : (K*K*Cin, Cout_pad)       BN-scale-folded weights, bf16
    # b_ref : (1, Cout_pad)             folded BN bias, f32
    # o_ref : (1, TH*W_out, Cout_pad)   flattened output row tile (lane-dense)
    h = pl.program_id(1)
    row0 = pl.multiple_of(h * (TH * stride), TH * stride)

    # In-kernel im2col: gather the K*K shifted windows for this row tile and
    # concatenate along the channel axis -> one large MXU contraction instead
    # of K*K tiny matmuls.
    taps = []
    for kh in range(K):                          # static unroll (K is small)
        for kw in range(K):
            if stride == 1:
                win = x_ref[0, pl.ds(row0 + kh, TH), pl.ds(kw, W_out), :]
            else:
                win = x_ref[0, pl.ds(row0 + kh, TH, stride),
                            pl.ds(kw, W_out, stride), :]
            taps.append(win)                     # (TH, W_out, Cin) bf16
    patches = jnp.concatenate(taps, axis=-1)     # (TH, W_out, K*K*Cin)
    patches = patches.reshape(TH * W_out, K * K * C_in)

    acc = jnp.dot(patches, w_ref[...], preferred_element_type=jnp.float32)
    y = jnp.maximum(acc + b_ref[0], 0.0)         # folded BN bias + ReLU (f32)
    o_ref[0] = y.astype(o_ref.dtype)             # stored in output layout, no reshape


def conv_bn_act(x_nchw, weight_oihw, gamma, beta, running_mean, running_var,
                *, stride=1, eps=1e-5):
    """Pallas ConvBnAct. x_nchw: (N, Cin, H, W); weight_oihw: (Cout, Cin, K, K)."""
    N, C_in, H, W = x_nchw.shape
    C_out, _, K, _ = weight_oihw.shape
    pad = K // 2
    H_out = (H + 2 * pad - K) // stride + 1
    W_out = (W + 2 * pad - K) // stride + 1
    Hp, Wp = H + 2 * pad, W + 2 * pad

    # ---- plain-JAX glue: layout, padding, BN folding into weights/bias ----
    x = jnp.transpose(x_nchw, (0, 2, 3, 1))                        # NHWC
    x = jnp.pad(x, ((0, 0), (pad, pad), (pad, pad), (0, 0)))
    x = x.astype(jnp.bfloat16)                                     # halve DMA bytes

    inv_std = jax.lax.rsqrt(running_var.astype(jnp.float32) + eps)
    scale = gamma.astype(jnp.float32) * inv_std                    # (Cout,)
    bias = beta.astype(jnp.float32) - running_mean.astype(jnp.float32) * scale

    # Fold BN scale into the conv weights; reshape to (K*K*Cin, Cout).
    w = jnp.transpose(weight_oihw, (2, 3, 1, 0)).astype(jnp.float32) * scale
    w = w.reshape(K * K * C_in, C_out)

    # Pad Cout to a full lane width for a lane-dense MXU N dim and output store.
    C_out_pad = ((C_out + 127) // 128) * 128
    w = jnp.pad(w, ((0, 0), (0, C_out_pad - C_out))).astype(jnp.bfloat16)
    bias = jnp.pad(bias, (0, C_out_pad - C_out)).reshape(1, C_out_pad)

    TH = _pick_row_tile(H_out, W_out)
    n_h = H_out // TH

    kernel = partial(conv_bn_act_kernel, K=K, stride=stride, TH=TH,
                     W_out=W_out, C_in=C_in)

    out_flat = pl.pallas_call(
        kernel,
        out_shape=jax.ShapeDtypeStruct((N, H_out * W_out, C_out_pad),
                                       x_nchw.dtype),
        grid_spec=pltpu.PrefetchScalarGridSpec(
            num_scalar_prefetch=0,
            grid=(N, n_h),
            in_specs=[
                # Full padded image per batch element; block index is constant
                # across the h axis so it is DMAed once per n.
                pl.BlockSpec((1, Hp, Wp, C_in), lambda n, h: (n, 0, 0, 0)),
                # Folded weights / bias: constant block -> fetched once.
                pl.BlockSpec((K * K * C_in, C_out_pad), lambda n, h: (0, 0)),
                pl.BlockSpec((1, C_out_pad), lambda n, h: (0, 0)),
            ],
            out_specs=pl.BlockSpec((1, TH * W_out, C_out_pad),
                                   lambda n, h: (n, h, 0)),
        ),
        compiler_params=pltpu.CompilerParams(
            dimension_semantics=("parallel", "parallel")),
    )(x, w, bias)

    out = out_flat.reshape(N, H_out, W_out, C_out_pad)[..., :C_out]
    return jnp.transpose(out, (0, 3, 1, 2))                        # back to NCHW


def reference_conv_bn_act(x, weight, gamma, beta, rm, rv, *, stride=1, eps=1e-5):
    pad = weight.shape[-1] // 2
    y = jax.lax.conv_general_dilated(
        x, weight, window_strides=(stride, stride),
        padding=[(pad, pad), (pad, pad)],
        dimension_numbers=("NCHW", "OIHW", "NCHW"))
    inv_std = 1.0 / jnp.sqrt(rv + eps)
    scale = (gamma * inv_std).reshape(1, -1, 1, 1)
    bias = (beta - rm * gamma * inv_std).reshape(1, -1, 1, 1)
    return jnp.maximum(y * scale + bias, 0.0)


if __name__ == "__main__":
    # Small shapes consistent with ConvBnAct(in_chs=4, out_chs=8, kernel_size=3, stride=1)
    N, C_in, H, W = 2, 4, 16, 16
    C_out, K, stride = 8, 3, 1

    key = jax.random.PRNGKey(0)
    k_x, k_w, k_g, k_b, k_m, k_v = jax.random.split(key, 6)

    x = jax.random.normal(k_x, (N, C_in, H, W), jnp.float32)
    weight = jax.random.normal(k_w, (C_out, C_in, K, K), jnp.float32) * 0.1
    gamma = jax.random.normal(k_g, (C_out,), jnp.float32) * 0.1 + 1.0
    beta = jax.random.normal(k_b, (C_out,), jnp.float32) * 0.1
    running_mean = jax.random.normal(k_m, (C_out,), jnp.float32) * 0.1
    running_var = jax.random.uniform(k_v, (C_out,), jnp.float32,
                                     minval=0.5, maxval=1.5)

    out = conv_bn_act(x, weight, gamma, beta, running_mean, running_var,
                      stride=stride)
    out = jax.block_until_ready(out)

    ref = reference_conv_bn_act(x, weight, gamma, beta, running_mean,
                                running_var, stride=stride)
    assert out.shape == ref.shape == (N, C_out, H, W)
    # Tolerance loosened slightly for bf16 inputs/weights (f32 accumulation).
    assert jnp.allclose(out, ref, atol=2e-2, rtol=2e-2), "mismatch vs reference"

    print("KERNEL_OK")
</pallas_src>

<mosaic_0001>
module attributes {stable_mosaic.version = 11 : i64} {
  func.func @conv_bn_act_kernel(%arg0: i32, %arg1: i32, %arg2: memref<1x18x18x4xbf16, #tpu.memory_space<vmem>>, %arg3: memref<36x128xbf16, #tpu.memory_space<vmem>>, %arg4: memref<1x128xf32, #tpu.memory_space<vmem>>, %arg5: memref<1x128x128xf32, #tpu.memory_space<vmem>>) attributes {dimension_semantics = [#tpu.dimension_semantics<parallel>, #tpu.dimension_semantics<parallel>], iteration_bounds = array<i64: 2, 2>, scalar_prefetch = 0 : i64, scratch_operands = 0 : i64, tpu.core_type = #tpu.core_type<tc>, window_params = [{transform_indices = @transform_0, window_bounds = array<i64: 1, 18, 18, 4>}, {pipeline_mode = #tpu.pipeline_mode<synchronous>, transform_indices = @transform_1, window_bounds = array<i64: 36, 128>}, {pipeline_mode = #tpu.pipeline_mode<synchronous>, transform_indices = @transform_2, window_bounds = array<i64: 1, 128>}, {transform_indices = @transform_3, window_bounds = array<i64: 1, 128, 128>}]} {
    %c8_i32 = arith.constant 8 : i32
    %0 = arith.muli %arg1, %c8_i32 : i32
    %1 = tpu.assume_multiple %0, 8 : i32
    %c0_i32 = arith.constant 0 : i32
    %2 = arith.addi %1, %c0_i32 : i32
    %c0 = arith.constant 0 : index
    %3 = arith.index_cast %2 : i32 to index
    %c0_0 = arith.constant 0 : index
    %c0_1 = arith.constant 0 : index
    %4 = vector.load %arg2[%c0, %3, %c0_0, %c0_1] : memref<1x18x18x4xbf16, #tpu.memory_space<vmem>>, vector<1x8x16x4xbf16>
    %5 = vector.shape_cast %4 : vector<1x8x16x4xbf16> to vector<8x16x4xbf16>
    %c0_i32_2 = arith.constant 0 : i32
    %6 = arith.addi %1, %c0_i32_2 : i32
    %c0_3 = arith.constant 0 : index
    %7 = arith.index_cast %6 : i32 to index
    %c1 = arith.constant 1 : index
    %c0_4 = arith.constant 0 : index
    %8 = vector.load %arg2[%c0_3, %7, %c1, %c0_4] : memref<1x18x18x4xbf16, #tpu.memory_space<vmem>>, vector<1x8x16x4xbf16>
    %9 = vector.shape_cast %8 : vector<1x8x16x4xbf16> to vector<8x16x4xbf16>
    %c0_i32_5 = arith.constant 0 : i32
    %10 = arith.addi %1, %c0_i32_5 : i32
    %c0_6 = arith.constant 0 : index
    %11 = arith.index_cast %10 : i32 to index
    %c2 = arith.constant 2 : index
    %c0_7 = arith.constant 0 : index
    %12 = vector.load %arg2[%c0_6, %11, %c2, %c0_7] : memref<1x18x18x4xbf16, #tpu.memory_space<vmem>>, vector<1x8x16x4xbf16>
    %13 = vector.shape_cast %12 : vector<1x8x16x4xbf16> to vector<8x16x4xbf16>
    %c1_i32 = arith.constant 1 : i32
    %14 = arith.addi %1, %c1_i32 : i32
    %c0_8 = arith.constant 0 : index
    %15 = arith.index_cast %14 : i32 to index
    %c0_9 = arith.constant 0 : index
    %c0_10 = arith.constant 0 : index
    %16 = vector.load %arg2[%c0_8, %15, %c0_9, %c0_10] : memref<1x18x18x4xbf16, #tpu.memory_space<vmem>>, vector<1x8x16x4xbf16>
    %17 = vector.shape_cast %16 : vector<1x8x16x4xbf16> to vector<8x16x4xbf16>
    %c1_i32_11 = arith.constant 1 : i32
    %18 = arith.addi %1, %c1_i32_11 : i32
    %c0_12 = arith.constant 0 : index
    %19 = arith.index_cast %18 : i32 to index
    %c1_13 = arith.constant 1 : index
    %c0_14 = arith.constant 0 : index
    %20 = vector.load %arg2[%c0_12, %19, %c1_13, %c0_14] : memref<1x18x18x4xbf16, #tpu.memory_space<vmem>>, vector<1x8x16x4xbf16>
    %21 = vector.shape_cast %20 : vector<1x8x16x4xbf16> to vector<8x16x4xbf16>
    %c1_i32_15 = arith.constant 1 : i32
    %22 = arith.addi %1, %c1_i32_15 : i32
    %c0_16 = arith.constant 0 : index
    %23 = arith.index_cast %22 : i32 to index
    %c2_17 = arith.constant 2 : index
    %c0_18 = arith.constant 0 : index
    %24 = vector.load %arg2[%c0_16, %23, %c2_17, %c0_18] : memref<1x18x18x4xbf16, #tpu.memory_space<vmem>>, vector<1x8x16x4xbf16>
    %25 = vector.shape_cast %24 : vector<1x8x16x4xbf16> to vector<8x16x4xbf16>
    %c2_i32 = arith.constant 2 : i32
    %26 = arith.addi %1, %c2_i32 : i32
    %c0_19 = arith.constant 0 : index
    %27 = arith.index_cast %26 : i32 to index
    %c0_20 = arith.constant 0 : index
    %c0_21 = arith.constant 0 : index
    %28 = vector.load %arg2[%c0_19, %27, %c0_20, %c0_21] : memref<1x18x18x4xbf16, #tpu.memory_space<vmem>>, vector<1x8x16x4xbf16>
    %29 = vector.shape_cast %28 : vector<1x8x16x4xbf16> to vector<8x16x4xbf16>
    %c2_i32_22 = arith.constant 2 : i32
    %30 = arith.addi %1, %c2_i32_22 : i32
    %c0_23 = arith.constant 0 : index
    %31 = arith.index_cast %30 : i32 to index
    %c1_24 = arith.constant 1 : index
    %c0_25 = arith.constant 0 : index
    %32 = vector.load %arg2[%c0_23, %31, %c1_24, %c0_25] : memref<1x18x18x4xbf16, #tpu.memory_space<vmem>>, vector<1x8x16x4xbf16>
    %33 = vector.shape_cast %32 : vector<1x8x16x4xbf16> to vector<8x16x4xbf16>
    %c2_i32_26 = arith.constant 2 : i32
    %34 = arith.addi %1, %c2_i32_26 : i32
    %c0_27 = arith.constant 0 : index
    %35 = arith.index_cast %34 : i32 to index
    %c2_28 = arith.constant 2 : index
    %c0_29 = arith.constant 0 : index
    %36 = vector.load %arg2[%c0_27, %35, %c2_28, %c0_29] : memref<1x18x18x4xbf16, #tpu.memory_space<vmem>>, vector<1x8x16x4xbf16>
    %37 = vector.shape_cast %36 : vector<1x8x16x4xbf16> to vector<8x16x4xbf16>
    %38 = tpu.concatenate %5, %9, %13, %17, %21, %25, %29, %33, %37 in 2 : vector<8x16x4xbf16>, vector<8x16x4xbf16>, vector<8x16x4xbf16>, vector<8x16x4xbf16>, vector<8x16x4xbf16>, vector<8x16x4xbf16>, vector<8x16x4xbf16>, vector<8x16x4xbf16>, vector<8x16x4xbf16> -> vector<8x16x36xbf16>
    %39 = vector.shape_cast %38 : vector<8x16x36xbf16> to vector<128x36xbf16>
    %c0_30 = arith.constant 0 : index
    %c0_31 = arith.constant 0 : index
    %40 = vector.load %arg3[%c0_30, %c0_31] : memref<36x128xbf16, #tpu.memory_space<vmem>>, vector<36x128xbf16>
    %cst = arith.constant dense<0.000000e+00> : vector<128x128xf32>
    %41 = tpu.matmul %39, %40, %cst {dimension_numbers = #tpu.dot_dimension_numbers<[1], [0], [0], [1], [0, 0, 1, 1], [], []>} : vector<128x36xbf16>, vector<36x128xbf16>, vector<128x128xf32> -> vector<128x128xf32>
    %c0_32 = arith.constant 0 : index
    %c0_33 = arith.constant 0 : index
    %42 = vector.load %arg4[%c0_32, %c0_33] : memref<1x128xf32, #tpu.memory_space<vmem>>, vector<1x128xf32>
    %43 = vector.shape_cast %42 : vector<1x128xf32> to vector<128xf32>
    %44 = vector.shape_cast %43 : vector<128xf32> to vector<1x128xf32>
    %45 = vector.broadcast %44 : vector<1x128xf32> to vector<128x128xf32>
    %46 = arith.addf %41, %45 : vector<128x128xf32>
    %cst_34 = arith.constant 0.000000e+00 : f32
    %47 = vector.broadcast %cst_34 : f32 to vector<128x128xf32>
    %48 = arith.maximumf %46, %47 : vector<128x128xf32>
    %c0_35 = arith.constant 0 : index
    %c0_36 = arith.constant 0 : index
    %c0_37 = arith.constant 0 : index
    %49 = vector.load %arg5[%c0_35, %c0_36, %c0_37] : memref<1x128x128xf32, #tpu.memory_space<vmem>>, vector<1x128x128xf32>
    %50 = vector.shape_cast %49 : vector<1x128x128xf32> to vector<128x128xf32>
    %51 = vector.shape_cast %48 : vector<128x128xf32> to vector<1x128x128xf32>
    tpu.vector_store %arg5[%c0_35, %c0_36, %c0_37], %51 {strides = array<i32>} : memref<1x128x128xf32, #tpu.memory_space<vmem>>, vector<1x128x128xf32>,
    return
  }
  func.func @transform_0(%arg0: i32, %arg1: i32) -> (i32, i32, i32, i32) {
    %c0_i32 = arith.constant 0 : i32
    %c0_i32_0 = arith.constant 0 : i32
    %c0_i32_1 = arith.constant 0 : i32
    %c0_i32_2 = arith.constant 0 : i32
    return %arg0, %c0_i32, %c0_i32_0, %c0_i32_1 : i32, i32, i32, i32
  }
  func.func @transform_1(%arg0: i32, %arg1: i32) -> (i32, i32) {
    %c0_i32 = arith.constant 0 : i32
    %c0_i32_0 = arith.constant 0 : i32
    %c0_i32_1 = arith.constant 0 : i32
    return %c0_i32, %c0_i32_0 : i32, i32
  }
  func.func @transform_2(%arg0: i32, %arg1: i32) -> (i32, i32) {
    %c0_i32 = arith.constant 0 : i32
    %c0_i32_0 = arith.constant 0 : i32
    %c0_i32_1 = arith.constant 0 : i32
    return %c0_i32, %c0_i32_0 : i32, i32
  }
  func.func @transform_3(%arg0: i32, %arg1: i32) -> (i32, i32, i32) {
    %c0_i32 = arith.constant 0 : i32
    %c0_i32_0 = arith.constant 0 : i32
    return %arg0, %arg1, %c0_i32 : i32, i32, i32
  }
}

</mosaic_0001>

<bundles_post_ra>
// kernel: tpu_custom_call.1
= control target key start
LH: loop header
LB: loop body
LE: loop exit
PB: predicated region body
PF: predicated region fallthrough
CT: control target
= control target key end

     0   :  { %8 = vsyncpa [#allocation3], 0  ;;  %s2619_s0 = inlined_call_operand.vmem [shape: bf16[2,18,18,4], index: 0, kind: input, shape index: {}]   ;;  %s2620_s1 = inlined_call_operand.vmem [shape: bf16[36,128], index: 1, kind: input, shape index: {}]   ;;  %s2621_s2 = inlined_call_operand.vmem [shape: f32[1,128], index: 2, kind: input, shape index: {}]   ;;  %s2622_s3 = inlined_call_operand.hbm [shape: f32[2,256,128], index: 3, kind: output, shape index: {}]  }
   0x1   :  { %10 = vsyncpa [#allocation3 + $0x1], 0  ;;  %s1954_s12 = smov 0   ;;  %s1956_s13 = smov 0  }
   0x2   :  { %s1958_s14 = smov 0   ;;  %s1960_s15 = smov 0  }
   0x3   :  { %s1962_s16 = smov 0   ;;  %s1964_s17 = smov 0  }
   0x4   :  { %s1966_s18 = smov 0   ;;  %s1968_s19 = smov 0  }
   0x5 LB: > { %s1462_s20 = sadd.s32 4294967295, %s1922_s19   ;;  %s1463_s21 = sadd.s32 4294967294, %s1922_s19   ;;  %s1922_s19 = sphi %s1968_s19, %s16_s19   ;;  %s1918_s18 = sphi %s1966_s18, %s2631_s18   ;;  %s1914_s17 = sphi %s1964_s17, %s2630_s17   ;;  %s1910_s16 = sphi %s1962_s16, %s2629_s16   ;;  %s1906_s15 = sphi %s1960_s15, %s2628_s15   ;;  %s1902_s14 = sphi %s1958_s14, %s2627_s14   ;;  %s1898_s13 = sphi %s1956_s13, %s2626_s13   ;;  %s1894_s12 = sphi %s1954_s12, %s2625_s12  }
   0x6   : > { %s25_s22 = sadd.s32 1, %s1914_s17  ;;  %s28_s23 = sadd.s32 1, %s1918_s18 }
   0x7   : > { %p26_p0 = scmp.ge.s32.totalorder %s25_s22, 2  ;;  %p115_p1 = scmp.ne.s32.totalorder %s1902_s14, %s1898_s13 }
   0x8   : > { %p116_p2 = scmp.eq.s32.totalorder %s1462_s20, 3  ;;  %p121_p5 = scmp.ne.s32.totalorder %s1898_s13, %s1894_s12 }
   0x9   : > { %s2633_s22 = smov (%p26_p0, %s25_s22), 0  ;;  %s2635_s23 = smov (!%p26_p0, %s28_s23), %s1918_s18 }
   0xa   : > { %s101_s24 = ssub.s32 %s1914_s17, %s2633_s22  ;;  %p2005_p3 = por %p116_p2, %p115_p1 }
   0xb   : > { %p30_p4 = scmp.ge.s32.totalorder %s2635_s23, 2  ;;  %p122_p6 = scmp.eq.s32.totalorder %s1463_s21, 3 }
   0xc   : > { %p1466_p7 = scmp.ge.s32.totalorder %s1922_s19, 1  ;;  %p154_p9 = scmp.lt.s32.totalorder %s1922_s19, 5 }
   0xd   : > { %s2637_s23 = smov (%p30_p4, %s2635_s23), 0  ;;  %p2014_p8 = por %p122_p6, %p121_p5 }
   0xe   : > { %s100_s27 = ssub.s32 %s1918_s18, %s2637_s23  ;;  %s105_s28 = sadd.s32 1, %s1902_s14 }
   0xf   : > { %s102_s29 = sor.u32 %s101_s24, %s100_s27  ;;  %p155_p10 = pnand %p1466_p7, %p154_p9 }
  0x10   : > { %p103_p11 = scmp.eq.s32.totalorder %s102_s29, 0  ;;  %p178_p12 = scmp.lt.s32.totalorder (!%p155_p10), %s1910_s16, 1  ;;  %vm494_vm0 = vcmask (!%p155_p10), 1046528   ;;  %vm357_vm1 = vsmask.f32 (!%p155_p10), 7424  ;;  %vm1227_vm2 = vcmask (!%p155_p10), 1041408  }
  0x11   : > { %158 = sbr.rel (%p155_p10) target bundleno = 510 (0x1fe), region = 32  ;;  %s1924_s11 = smov (!%p155_p10), 12   ;;  %vm1047_vm3 = vcmask (!%p155_p10), 31744   ;;  %vm1064_vm4 = vcmask (!%p155_p10), 64512   ;;  %vm1081_vm5 = vcmask (!%p155_p10), 97280   ;;  %vm1098_vm6 = vcmask (!%p155_p10), 130048  }
  0x12   : > { %s2023_s30 = scalar_select %p103_p11, %s1902_s14, %s105_s28  }
  0x13   : > { %s1630_s5 = smul.u32 (!%p155_p10), 96, %s1906_s15  ;;  %s1925_s20 = smov (!%p155_p10), 8   ;;  %vm1115_vm7 = vcmask (!%p155_p10), 162816   ;;  %vm1132_vm8 = vcmask (!%p155_p10), 195584   ;;  %vm1149_vm9 = vcmask (!%p155_p10), 228352   ;;  %vm1166_vm10 = vcmask (!%p155_p10), 261120  }
  0x14   : > { %s1926_s21 = smov (!%p155_p10), 4   ;;  %s1927_s24 = smov (!%p155_p10), 16   ;;  %vm1210_vm11 = vcmask (!%p155_p10), 293888  }
  0x15   : > { %s1928_s27 = smov (!%p155_p10), 20   ;;  %s1930_s7 = smov (!%p155_p10), 28  }
  0x16   : > { %s1931_s8 = smov (!%p155_p10), 32   ;;  %s1625_s29 = sshll.u32 (!%p155_p10), %s1906_s15, 4 }
  0x18   : > { %s179_s4 = scalar_select %p178_p12, %s1910_s16, 1 }
  0x1a   : > { %s1672_s6 = smul.u32 216, %s179_s4  ;;  %s1929_s4 = smov 24  }
  0x1c   : > { %s182_s9 = scalar_lea.vmem %s2619_s0, %s1672_s6 }
  0x1d   : > { %s2031_s10 = scalar_lea.vmem %s182_s9, %s1630_s5 }
  0x1e   : > { %v1482_v0 = vld [vmem:[%s2031_s10 + $0x3c] sm:$0xf]  ;;  %v2035_v1 = vld [vmem:[%s2031_s10 + $0x40] sm:$0xf]  ;;  %v1474_v3 = vld [vmem:[%s2031_s10 + $0xc] sm:$0xf] }
  0x1f   : > { %v2038_v2 = vcombine.low %v1482_v0, %v2035_v1  ;;  %v2042_v4 = vld [vmem:[%s2031_s10 + $0x10] sm:$0xf]  ;;  %v198_v6 = vld [vmem:[%s2031_s10 + $0x34] sm:$0xf]  ;;  %v190_v12 = vld [vmem:[%s2031_s10 + $0x4] sm:$0xf] }
  0x20   : > { %v2045_v5 = vcombine.low %v1474_v3, %v2042_v4  ;;  %v217_v7 = vld [vmem:[%s2031_s10 + $0x30] sm:$0xe]  ;;  %v2052_v8 = vld [vmem:[%s2031_s10 + $0x38] ss:$0 sps:$4 sm:$0x11]  }
  0x21   : > { %583 = vrot.lane.b32.xlu1 %v2038_v2, %s1924_s11  ;;  %v1560_v9 = vcombine.low %v217_v7, %v198_v6  ;;  %v197_v10 = vld [vmem:[%s2031_s10 + $0x30] sm:$0xf]  ;;  %v666_v11 = vshll.u32 %v2038_v2, 16  ;;  %v508_v14 = vrot.slane %v2052_v8, 1  ;;  %v213_v15 = vld [vmem:[%s2031_s10] sm:$0xe] }
  0x22   : > { %575 = vrot.lane.b32.xlu0 %v2045_v5, %s1924_s11  ;;  %v189_v16 = vld [vmem:[%s2031_s10] sm:$0xf]  ;;  %v618_v17 = vshll.u32 %v2045_v5, 16  ;;  %v2063_v18 = vcombine.low %v197_v10, %v198_v6  ;;  %v1760_v19 = vld [vmem:[%s2031_s10 + $0x8] ss:$0 sps:$4 sm:$0x11]   ;;  %v1556_v20 = vcombine.low %v213_v15, %v190_v12 }
  0x23   : > { %v507_v13 = vrot.slane %v1560_v9, 1  ;;  %v199_v21 = vld [vmem:[%s2031_s10 + $0x3c] sm:$0xf]  ;;  %v2068_v23 = vcombine.low %v189_v16, %v190_v12  ;;  %v200_v24 = vld [vmem:[%s2031_s10 + $0x40] sm:$0xf]  ;;  %v496_v27 = vrot.slane %v1760_v19, 1 }
  0x24   : > { %v218_v25 = vld [vmem:[%s2031_s10 + $0x3c] sm:$0xe]  ;;  %v495_v26 = vrot.slane %v1556_v20, 1  ;;  %v1764_v28 = vld [vmem:[%s2031_s10 + $0x44] ss:$0 sps:$4 sm:$0x11]   ;;  %v2075_v31 = vcombine.low %v199_v21, %v200_v24 }
  0x25   : > { %v509_v22 = vsel %vm494_vm0, %v507_v13, %v508_v14  ;;  %v1561_v29 = vcombine.low %v218_v25, %v200_v24  ;;  %v407_v30 = vshrl.u32 %v2063_v18, 16  ;;  %v191_v32 = vld [vmem:[%s2031_s10 + $0xc] sm:$0xf]  ;;  %v192_v33 = vld [vmem:[%s2031_s10 + $0x10] sm:$0xf]  ;;  %v511_v36 = vrot.slane %v1764_v28, 1 }
  0x26   : > { %527 = vrot.lane.b32.xlu1 %v509_v22, %s1925_s20  ;;  %v497_v34 = vsel %vm494_vm0, %v495_v26, %v496_v27  ;;  %v214_v37 = vld [vmem:[%s2031_s10 + $0xc] sm:$0xe]  ;;  %v2081_v38 = vcombine.low %v191_v32, %v192_v33  ;;  %v1767_v39 = vld [vmem:[%s2031_s10 + $0x14] ss:$0 sps:$4 sm:$0x11]   ;;  %v359_v41 = vshrl.u32 %v2068_v23, 16 }
  0x27   : > { %v510_v35 = vrot.slane %v1561_v29, 1  ;;  %519 = vrot.lane.b32.xlu0 %v497_v34, %s1925_s20  ;;  %v1557_v40 = vcombine.low %v214_v37, %v192_v33  ;;  %v361_v42 = vshll.u32 %v2068_v23, 16  ;;  %v366_v43 = vshll.u32 %v1760_v19, 16  ;;  %v1484_v52 = vld [vmem:[%s2031_s10 + $0x48] sm:$0xf] }
  0x28   : > { %v371_v45 = vshrl.u32 %v2081_v38, 16  ;;  %v373_v46 = vshll.u32 %v2081_v38, 16  ;;  %v419_v47 = vshrl.u32 %v2075_v31, 16  ;;  %v499_v49 = vrot.slane %v1767_v39, 1  ;;  %v2095_v57 = vld [vmem:[%s2031_s10 + $0x4c] sm:$0xf] }
  0x29   : > { %v512_v44 = vsel %vm494_vm0, %v510_v35, %v511_v36  ;;  %v498_v48 = vrot.slane %v1557_v40, 1  ;;  %v378_v50 = vshll.u32 %v1767_v39, 16  ;;  %v363_v51 = vrot.slane %v361_v42, 1  ;;  %v1476_v62 = vld [vmem:[%s2031_s10 + $0x18] sm:$0xf] }
  0x2a   : > { %529 = vrot.lane.b32.xlu1 %v512_v44, %s1925_s20  ;;  %v375_v53 = vrot.slane %v373_v46, 1  ;;  %v368_v54 = vrot.slane %v366_v43, 1  ;;  %v421_v55 = vshll.u32 %v2075_v31, 16  ;;  %v426_v56 = vshll.u32 %v1764_v28, 16  ;;  %v2101_v63 = vld [vmem:[%s2031_s10 + $0x1c] sm:$0xf] }
  0x2b   : > { %v500_v58 = vsel %vm494_vm0, %v498_v48, %v499_v49  ;;  %v380_v59 = vrot.slane %v378_v50, 1  ;;  %v364_v60 = vor.u32 %v363_v51, %v359_v41  ;;  %v409_v61 = vshll.u32 %v2063_v18, 16  ;;  %v2108_v13 = vld [vmem:[%s2031_s10 + $0x44] ss:$0 sps:$4 sm:$0x11]  }
  0x2c   : > { %521 = vrot.lane.b32.xlu0 %v500_v58, %s1925_s20  ;;  %v376_v0 = vor.u32 %v375_v53, %v371_v45  ;;  %v423_v3 = vrot.slane %v421_v55, 1  ;;  %v428_v6 = vrot.slane %v426_v56, 1  ;;  %v414_v7 = vshll.u32 %v2052_v8, 16  ;;  %v2113_v20 = vld [vmem:[%s2031_s10 + $0x14] ss:$0 sps:$4 sm:$0x11]  }
  0x2d   : > { %v369_v9 = vsel %vm357_vm1, %v364_v60, %v368_v54  ;;  %v411_v10 = vrot.slane %v409_v61, 1  ;;  %v1569_v12 = vcombine.low %v1484_v52, %v2095_v57  ;;  %v1565_v19 = vcombine.low %v1476_v62, %v2101_v63  ;;  %v2120_v24 = vld [vmem:[%s2031_s10 + $0x50] ss:$0 sps:$4 sm:$0x11]   ;;  %v1502_v40 = vld [vmem:[%s2031_s10 + $0x3c] sm:$0xe] }
  0x2e   : > { %v381_v14 = vsel %vm357_vm1, %v376_v0, %v380_v59  ;;  %v424_v15 = vor.u32 %v423_v3, %v419_v47  ;;  %v416_v16 = vrot.slane %v414_v7, 1  ;;  %v664_v21 = vshrl.u32 %v2038_v2, 16  ;;  %v1498_v43 = vld [vmem:[%s2031_s10 + $0xc] sm:$0xe]  ;;  %v1503_v49 = vld [vmem:[%s2031_s10 + $0x48] sm:$0xe] }
  0x2f   : > { %456 = vrot.lane.b32.xlu1 %v381_v14, %s1926_s21  ;;  %v412_v8 = vor.u32 %v411_v10, %v407_v30  ;;  %v668_v22 = vrot.slane %v666_v11, 1  ;;  %v678_v26 = vshll.u32 %v1569_v12, 16  ;;  %v671_v27 = vshll.u32 %v2108_v13, 16  ;;  %v2131_v11 = vld [vmem:[%s2031_s10 + $0x20] ss:$0 sps:$4 sm:$0x11]  }
  0x30   : > { %454 = vrot.lane.b32.xlu0 %v369_v9, %s1926_s21  ;;  %v429_v25 = vsel %vm357_vm1, %v424_v15, %v428_v6  ;;  %v616_v28 = vshrl.u32 %v2045_v5, 16  ;;  %v630_v30 = vshll.u32 %v1565_v19, 16  ;;  %v620_v32 = vrot.slane %v618_v17, 1  ;;  %v1499_v53 = vld [vmem:[%s2031_s10 + $0x18] sm:$0xe] }
  0x31   : > { %v417_v29 = vsel %vm357_vm1, %v412_v8, %v416_v16  ;;  %v623_v2 = vshll.u32 %v2113_v20, 16  ;;  %v669_v33 = vor.u32 %v668_v22, %v664_v21  ;;  %v673_v34 = vrot.slane %v671_v27, 1  ;;  %v1516_v54 = vld [vmem:[%s2031_s10 + $0x48] sm:$0xf]  ;;  %v1508_v55 = vld [vmem:[%s2031_s10 + $0x18] sm:$0xf] }
  0x32   : > { %v621_v35 = vor.u32 %v620_v32, %v616_v28  ;;  %v676_v36 = vshrl.u32 %v1569_v12, 16  ;;  %v680_v37 = vrot.slane %v678_v26, 1  ;;  %v683_v39 = vshll.u32 %v2120_v24, 16  ;;  %v2158_v60 = vld [vmem:[%s2031_s10 + $0x1c] sm:$0xf] }
  0x33   : > { %464 = vrot.lane.b32.xlu1 %v429_v25, %s1926_s21  ;;  %v625_v5 = vrot.slane %v623_v2, 1  ;;  %v628_v17 = vshrl.u32 %v1565_v19, 16  ;;  %v632_v41 = vrot.slane %v630_v30, 1  ;;  %v635_v42 = vshll.u32 %v2131_v11, 16  ;;  %v1518_v7 = vld [vmem:[%s2031_s10 + $0x54] sm:$0xf] }
  0x34   : > { %462 = vrot.lane.b32.xlu0 %v417_v29, %s1926_s21  ;;  %v1584_v44 = vcombine.low %v1502_v40, %v2035_v1  ;;  %v674_v45 = vsel %vm357_vm1, %v669_v33, %v673_v34  ;;  %v681_v46 = vor.u32 %v680_v37, %v676_v36  ;;  %v685_v47 = vrot.slane %v683_v39, 1  ;;  %v2150_v1 = vld [vmem:[%s2031_s10 + $0x4c] sm:$0xf]  ;;  %v2168_v9 = vld [vmem:[%s2031_s10 + $0x58] sm:$0xf] }
  0x35   : > { %v1580_v48 = vcombine.low %v1498_v43, %v2042_v4  ;;  %v626_v50 = vsel %vm357_vm1, %v621_v35, %v625_v5  ;;  %v633_v51 = vor.u32 %v632_v41, %v628_v17  ;;  %v637_v52 = vrot.slane %v635_v42, 1  ;;  %v2175_v14 = vld [vmem:[%s2031_s10 + $0x28] sm:$0xf]  ;;  %v2181_v21 = vld [vmem:[%s2031_s10 + $0x50] ss:$0 sps:$4 sm:$0x11]  }
  0x36   : > { %v1585_v56 = vcombine.low %v1503_v49, %v2095_v57  ;;  %v686_v4 = vsel %vm357_vm1, %v681_v46, %v685_v47  ;;  %v763_v58 = vrot.slane %v1584_v44, 1  ;;  %v764_v59 = vrot.slane %v2108_v13, 1  ;;  %v1510_v13 = vld [vmem:[%s2031_s10 + $0x24] sm:$0xf]  ;;  %v201_v37 = vld [vmem:[%s2031_s10 + $0x48] sm:$0xf] }
  0x37   : > { %585 = vrot.lane.b32.xlu1 %v1569_v12, %s1924_s11  ;;  %v1581_v61 = vcombine.low %v1499_v53, %v2101_v63  ;;  %v638_v62 = vsel %vm357_vm1, %v633_v51, %v637_v52  ;;  %v751_v0 = vrot.slane %v1580_v48, 1  ;;  %v752_v3 = vrot.slane %v2113_v20, 1  ;;  %v2188_v26 = vld [vmem:[%s2031_s10 + $0x20] ss:$0 sps:$4 sm:$0x11]  }
  0x38   : > { %577 = vrot.lane.b32.xlu0 %v1565_v19, %s1924_s11  ;;  %v1592_v57 = vcombine.low %v1516_v54, %v2150_v1  ;;  %v1588_v6 = vcombine.low %v1508_v55, %v2158_v60  ;;  %v765_v10 = vsel %vm494_vm0, %v763_v58, %v764_v59  ;;  %v766_v63 = vrot.slane %v1585_v56, 1  ;;  %v2194_v34 = vld [vmem:[%s2031_s10 + $0x5c] ss:$0 sps:$4 sm:$0x11]   ;;  %v2203_v39 = vld [vmem:[%s2031_s10 + $0x4c] sm:$0xf] }
  0x39   : > { %v767_v12 = vrot.slane %v2120_v24, 1  ;;  %v753_v15 = vsel %vm494_vm0, %v751_v0, %v752_v3  ;;  %v754_v16 = vrot.slane %v1581_v61, 1  ;;  %v755_v19 = vrot.slane %v2131_v11, 1  ;;  %v2199_v36 = vld [vmem:[%s2031_s10 + $0x2c] ss:$0 sps:$4 sm:$0x11]  }
  0x3a   : > { %v922_v20 = vshll.u32 %v1592_v57, 16  ;;  %v1593_v8 = vcombine.low %v1518_v7, %v2168_v9  ;;  %v874_v22 = vshll.u32 %v1588_v6, 16  ;;  %v1589_v24 = vcombine.low %v1510_v13, %v2175_v14  ;;  %v193_v40 = vld [vmem:[%s2031_s10 + $0x18] sm:$0xf]  ;;  %v2207_v17 = vld [vmem:[%s2031_s10 + $0x1c] sm:$0xf] }
  0x3b   : > { %719 = vrot.lane.b32.xlu1 %v674_v45, %s1927_s24  ;;  %v768_v25 = vsel %vm494_vm0, %v766_v63, %v767_v12  ;;  %v756_v27 = vsel %vm494_vm0, %v754_v16, %v755_v19  ;;  %v920_v29 = vshrl.u32 %v1592_v57, 16  ;;  %v927_v32 = vshll.u32 %v2181_v21, 16  ;;  %v1825_v41 = vld [vmem:[%s2620_s1] sm:$0xff]   ;;  %v1536_v42 = vld [vmem:[%s2031_s10 + $0x48] sm:$0xe] }
  0x3c   : > { %711 = vrot.lane.b32.xlu0 %v626_v50, %s1927_s24  ;;  %v934_v28 = vshll.u32 %v1593_v8, 16  ;;  %v924_v30 = vrot.slane %v922_v20, 1  ;;  %v886_v2 = vshll.u32 %v1589_v24, 16  ;;  %v872_v11 = vshrl.u32 %v1588_v6, 16  ;;  %v1532_v47 = vld [vmem:[%s2031_s10 + $0x18] sm:$0xe]  ;;  %1642 = vmatprep.subr.bf16.mxu0 %v1825_v41 }
  0x3d   : > { %v876_v33 = vrot.slane %v874_v22, 1  ;;  %v879_v35 = vshll.u32 %v2188_v26, 16  ;;  %v929_v43 = vrot.slane %v927_v32, 1  ;;  %v932_v44 = vshrl.u32 %v1593_v8, 16  ;;  %1664 = vmatprep.subr.bf16.mxu1 %v1825_v41  ;;  %1643 = vmatpush3.bf16.msra.mxu0 %v1825_v41  ;;  %v1826_v56 = vld [vmem:[%s2620_s1 + $0x8] sm:$0xff]  }
  0x3e   : > { %v925_v5 = vor.u32 %v924_v30, %v920_v29  ;;  %v936_v45 = vrot.slane %v934_v28, 1  ;;  %v939_v46 = vshll.u32 %v2194_v34, 16  ;;  %v884_v48 = vshrl.u32 %v1589_v24, 16  ;;  %1667 = vmatpush3.bf16.msra.mxu1 %v1825_v41  ;;  %v2231_v61 = vld [vmem:[%s2031_s10 + $0x50] ss:$0 sps:$4 sm:$0x11]   ;;  %1644 = vmatprep.subr.bf16.mxu0 %v1826_v56 }
  0x3f   : > { %721 = vrot.lane.b32.xlu1 %v686_v4, %s1927_s24  ;;  %v888_v49 = vrot.slane %v886_v2, 1  ;;  %v891_v50 = vshll.u32 %v2199_v36, 16  ;;  %v2219_v51 = vcombine.low %v201_v37, %v2203_v39  ;;  %v877_v52 = vor.u32 %v876_v33, %v872_v11  ;;  %v203_v7 = vld [vmem:[%s2031_s10 + $0x54] sm:$0xf]  ;;  %1665 = vmatprep.subr.bf16.mxu1 %v1826_v56  ;;  %v195_v13 = vld [vmem:[%s2031_s10 + $0x24] sm:$0xf] }
  0x40   : > { %713 = vrot.lane.b32.xlu0 %v638_v62, %s1927_s24  ;;  %v881_v53 = vrot.slane %v879_v35, 1  ;;  %v2222_v54 = vcombine.low %v193_v40, %v2207_v17  ;;  %v1608_v55 = vcombine.low %v1536_v42, %v2150_v1  ;;  %v1604_v4 = vcombine.low %v1532_v47, %v2158_v60  ;;  %v1537_v16 = vld [vmem:[%s2031_s10 + $0x54] sm:$0xe]  ;;  %v2273_v40 = vld [vmem:[%s2031_s10 + $0x5c] ss:$0 sps:$4 sm:$0x11]  }
  0x41   : > { %v937_v58 = vor.u32 %v936_v45, %v932_v44  ;;  %v941_v59 = vrot.slane %v939_v46, 1  ;;  %v930_v1 = vsel %vm357_vm1, %v925_v5, %v929_v43  ;;  %v889_v62 = vor.u32 %v888_v49, %v884_v48  ;;  %1645 = vmatpush3.bf16.msra.mxu0 %v1826_v56 }
  0x42   : > { %v893_v0 = vrot.slane %v891_v50, 1  ;;  %v433_v3 = vshll.u32 %v2219_v51, 16  ;;  %v882_v60 = vsel %vm357_vm1, %v877_v52, %v881_v53  ;;  %v1019_v63 = vrot.slane %v1608_v55, 1  ;;  %1668 = vmatpush3.bf16.msra.mxu1 %v1826_v56  ;;  %v219_v53 = vld [vmem:[%s2031_s10 + $0x48] sm:$0xe] }
  0x43   : > { %783 = vrot.lane.b32.xlu1 %v765_v10, %s1928_s27  ;;  %v2243_v10 = vld [vmem:[%s2031_s10 + $0x58] sm:$0xf]  ;;  %v1020_v12 = vrot.slane %v2181_v21, 1  ;;  %v942_v19 = vsel %vm357_vm1, %v937_v58, %v941_v59  ;;  %v1007_v20 = vrot.slane %v1604_v4, 1  ;;  %v438_v22 = vshll.u32 %v2231_v61, 16 }
  0x44   : > { %775 = vrot.lane.b32.xlu0 %v753_v15, %s1928_s27  ;;  %v2248_v15 = vld [vmem:[%s2031_s10 + $0x28] sm:$0xf]  ;;  %v894_v21 = vsel %vm357_vm1, %v889_v62, %v893_v0  ;;  %v2260_v28 = vcombine.low %v203_v7, %v2243_v10  ;;  %v383_v29 = vshrl.u32 %v2222_v54, 16  ;;  %v1609_v2 = vcombine.low %v1537_v16, %v2168_v9  ;;  %v2278_v9 = vld [vmem:[%s2031_s10 + $0x2c] ss:$0 sps:$4 sm:$0x11]  }
  0x45   : > { %v2265_v32 = vcombine.low %v195_v13, %v2248_v15  ;;  %v440_v33 = vrot.slane %v438_v22, 1  ;;  %v1021_v35 = vsel %vm494_vm0, %v1019_v63, %v1020_v12  ;;  %v1023_v45 = vrot.slane %v2194_v34, 1  ;;  %v220_v7 = vld [vmem:[%s2031_s10 + $0x54] sm:$0xe]  ;;  %v216_v63 = vld [vmem:[%s2031_s10 + $0x24] sm:$0xe] }
  0x46   : > { %v445_v5 = vshll.u32 %v2260_v28, 16  ;;  %v1022_v44 = vrot.slane %v1609_v2, 1  ;;  %v1011_v47 = vrot.slane %v2199_v36, 1  ;;  %v443_v49 = vshrl.u32 %v2260_v28, 16  ;;  %v215_v36 = vld [vmem:[%s2031_s10 + $0x18] sm:$0xe] }
  0x47   : > { %785 = vrot.lane.b32.xlu1 %v768_v25, %s1928_s27  ;;  %v431_v25 = vshrl.u32 %v2219_v51, 16  ;;  %v450_v52 = vshll.u32 %v2273_v40, 16  ;;  %v395_v56 = vshrl.u32 %v2265_v32, 16  ;;  %v402_v4 = vshll.u32 %v2278_v9, 16 }
  0x48   : > { %777 = vrot.lane.b32.xlu0 %v756_v27, %s1928_s27  ;;  %v435_v27 = vrot.slane %v433_v3, 1  ;;  %v447_v50 = vrot.slane %v445_v5, 1  ;;  %v1024_v58 = vsel %vm494_vm0, %v1022_v44, %v1023_v45  ;;  %v1562_v62 = vcombine.low %v219_v53, %v2203_v39  ;;  %v1827_v5 = vld [vmem:[%s2620_s1 + $0x10] ss:$0 sps:$4 sm:$0x33]  }
  0x49   : > { %v1558_v0 = vcombine.low %v215_v36, %v2207_v17  ;;  %v514_v12 = vrot.slane %v2231_v61, 1  ;;  %v1559_v61 = vcombine.low %v216_v63, %v2248_v15  ;;  %v2325_v15 = vld [vmem:[%s2031_s10 + $0x64] sm:$0xf]  ;;  %v2346_v44 = vld [vmem:[%s2031_s10 + $0x2c] ss:$0 sps:$4 sm:$0x11]   ;;  %1670 = vmatprep.subr.msk.bf16.mxu0 %vm1227_vm2, %v1827_v5  ;;  %1671 = vmatprep.subr.msk.bf16.mxu1 %vm1227_vm2, %v1827_v5 }
  0x4a   : > { %v436_v37 = vor.u32 %v435_v27, %v431_v25  ;;  %v448_v59 = vor.u32 %v447_v50, %v443_v49  ;;  %v513_v16 = vrot.slane %v1562_v62, 1  ;;  %v517_v27 = vrot.slane %v2273_v40, 1  ;;  %v2352_v53 = vld [vmem:[%s2031_s10 + $0x68] ss:$0 sps:$4 sm:$0x11]  }
  0x4b   : > { %839 = vrot.lane.b32.xlu1 %v1592_v57, %s1929_s4  ;;  %v2237_v57 = vld [vmem:[%s2031_s10 + $0x20] ss:$0 sps:$4 sm:$0x11]   ;;  %v501_v17 = vrot.slane %v1558_v0, 1  ;;  %v504_v2 = vrot.slane %v1559_v61, 1  ;;  %v707_v62 = vshll.u32 %v2352_v53, 16 }
  0x4c   : > { %831 = vrot.lane.b32.xlu0 %v1588_v6, %s1929_s4  ;;  %v385_v6 = vshll.u32 %v2222_v54, 16  ;;  %v441_v48 = vsel %vm357_vm1, %v436_v37, %v440_v33  ;;  %v502_v13 = vrot.slane %v2237_v57, 1  ;;  %v1480_v33 = vld [vmem:[%s2031_s10 + $0x30] sm:$0xf]  ;;  %v1504_v0 = vld [vmem:[%s2031_s10 + $0x54] sm:$0xe] }
  0x4d   : > { %v1500_v63 = vld [vmem:[%s2031_s10 + $0x24] sm:$0xe] }
  0x4e   : > { %v387_v30 = vrot.slane %v385_v6, 1  ;;  %v404_v6 = vrot.slane %v402_v4, 1 }
  0x4f   : > { %841 = vrot.lane.b32.xlu1 %v1593_v8, %s1929_s4  ;;  %v1008_v8 = vrot.slane %v2188_v26, 1  ;;  %v390_v26 = vshll.u32 %v2237_v57, 16  ;;  %v1478_v57 = vld [vmem:[%s2031_s10 + $0x24] sm:$0xf] }
  0x50   : > { %833 = vrot.lane.b32.xlu0 %v1589_v24, %s1929_s4  ;;  %v1533_v24 = vld [vmem:[%s2031_s10 + $0x24] sm:$0xe]  ;;  %v388_v42 = vor.u32 %v387_v30, %v383_v29  ;;  %v1488_v30 = vld [vmem:[%s2031_s10 + $0x60] sm:$0xf] }
  0x51   : > { %v1605_v11 = vcombine.low %v1533_v24, %v2175_v14  ;;  %v1009_v41 = vsel %vm494_vm0, %v1007_v20, %v1008_v8  ;;  %v392_v43 = vrot.slane %v390_v26, 1  ;;  %v397_v14 = vshll.u32 %v2265_v32, 16  ;;  %v1486_v20 = vld [vmem:[%s2031_s10 + $0x54] sm:$0xf]  ;;  %v2309_v8 = vld [vmem:[%s2031_s10 + $0x58] sm:$0xf] }
  0x52   : > { %v2315_v24 = vld [vmem:[%s2031_s10 + $0x28] sm:$0xf]  ;;  %v503_v26 = vsel %vm494_vm0, %v501_v17, %v502_v13  ;;  %v1571_v40 = vcombine.low %v1488_v30, %v2325_v15 }
  0x53   : > { %975 = vrot.lane.b32.xlu1 %v930_v1, %s1930_s7  ;;  %v1010_v46 = vrot.slane %v1605_v11, 1  ;;  %v393_v55 = vsel %vm357_vm1, %v388_v42, %v392_v43  ;;  %v399_v34 = vrot.slane %v397_v14, 1  ;;  %v452_v1 = vrot.slane %v450_v52, 1  ;;  %v2341_v43 = vld [vmem:[%s2031_s10 + $0x5c] ss:$0 sps:$4 sm:$0x11]  }
  0x54   : > { %967 = vrot.lane.b32.xlu0 %v882_v60, %s1930_s7  ;;  %v1566_v29 = vcombine.low %v1478_v57, %v2315_v24  ;;  %v505_v11 = vrot.slane %v2278_v9, 1  ;;  %v702_v45 = vshll.u32 %v1571_v40, 16  ;;  %v695_v49 = vshll.u32 %v2341_v43, 16  ;;  %v1501_v57 = vld [vmem:[%s2031_s10 + $0x30] sm:$0xe] }
  0x55   : > { %v1012_v3 = vsel %vm494_vm0, %v1010_v46, %v1011_v47  ;;  %v400_v60 = vor.u32 %v399_v34, %v395_v56  ;;  %v453_v39 = vsel %vm357_vm1, %v448_v59, %v452_v1  ;;  %v647_v56 = vshll.u32 %v2346_v44, 16  ;;  %v2356_v34 = vld [vmem:[%s2031_s10 + $0x38] ss:$0 sps:$4 sm:$0x11]  }
  0x56   : > { %v642_v42 = vshll.u32 %v1566_v29, 16  ;;  %v506_v9 = vsel %vm494_vm0, %v504_v2, %v505_v11  ;;  %v640_v50 = vshrl.u32 %v1566_v29, 16  ;;  %v700_v36 = vshrl.u32 %v1571_v40, 16  ;;  %v1512_v2 = vld [vmem:[%s2031_s10 + $0x30] sm:$0xf] }
  0x57   : > { %977 = vrot.lane.b32.xlu1 %v942_v19, %s1930_s7  ;;  %v1563_v19 = vcombine.low %v220_v7, %v2243_v10  ;;  %v405_v22 = vsel %vm357_vm1, %v400_v60, %v404_v6  ;;  %v515_v10 = vsel %vm494_vm0, %v513_v16, %v514_v12  ;;  %v704_v1 = vrot.slane %v702_v45, 1  ;;  %v2386_v11 = vld [vmem:[%s2031_s10 + $0x34] sm:$0xf]  ;;  %v2402_v45 = vld [vmem:[%s2031_s10 + $0x40] sm:$0xf] }
  0x58   : > { %969 = vrot.lane.b32.xlu0 %v894_v21, %s1930_s7  ;;  %v1570_v21 = vcombine.low %v1486_v20, %v2309_v8  ;;  %v644_v52 = vrot.slane %v642_v42, 1  ;;  %v659_v7 = vshll.u32 %v2356_v34, 16  ;;  %v1586_v12 = vcombine.low %v1504_v0, %v2309_v8  ;;  %v2396_v42 = vld [vmem:[%s2031_s10 + $0x70] sm:$0xf] }
  0x59   : > { %v516_v25 = vrot.slane %v1563_v19, 1  ;;  %v709_v16 = vrot.slane %v707_v62, 1  ;;  %v1582_v17 = vcombine.low %v1500_v63, %v2315_v24  ;;  %v1505_v19 = vld [vmem:[%s2031_s10 + $0x60] sm:$0xe] }
  0x5a   : > { %v690_v37 = vshll.u32 %v1570_v21, 16  ;;  %v688_v46 = vshrl.u32 %v1570_v21, 16  ;;  %v645_v59 = vor.u32 %v644_v52, %v640_v50  ;;  %v661_v61 = vrot.slane %v659_v7, 1  ;;  %v1520_v24 = vld [vmem:[%s2031_s10 + $0x60] sm:$0xf] }
  0x5b   : > { %1039 = vrot.lane.b32.xlu1 %v1021_v35, %s1931_s8  ;;  %v2331_v35 = vld [vmem:[%s2031_s10 + $0x34] sm:$0xf]  ;;  %v1587_v8 = vcombine.low %v1505_v19, %v2325_v15  ;;  %v758_v15 = vrot.slane %v2346_v44, 1  ;;  %v1514_v44 = vld [vmem:[%s2031_s10 + $0x3c] sm:$0xf] }
  0x5c   : > { %1031 = vrot.lane.b32.xlu0 %v1009_v41, %s1931_s8  ;;  %v518_v41 = vsel %vm494_vm0, %v516_v25, %v517_v27  ;;  %v1567_v14 = vcombine.low %v1480_v33, %v2331_v35  ;;  %v692_v47 = vrot.slane %v690_v37, 1  ;;  %v770_v25 = vrot.slane %v2341_v43, 1  ;;  %v2379_v27 = vld [vmem:[%s2031_s10 + $0x64] sm:$0xf] }
  0x5d   : > { %v1594_v33 = vcombine.low %v1520_v24, %v2379_v27  ;;  %v1821_v50 = vld [vmem:[%s2031_s10 + $0x68] ss:$0 sps:$4 sm:$0x11]  }
  0x5e   : > { %v693_v4 = vor.u32 %v692_v47, %v688_v46  ;;  %v652_v60 = vshrl.u32 %v1567_v14, 16 }
  0x5f   : > { %466 = vrot.lane.b32.xlu1 %v441_v48, %s1926_s21  ;;  %v1229_v48 = vsel %vm1227_vm2, %v1827_v5, 0  ;;  %v1590_v5 = vcombine.low %v1512_v2, %v2386_v11  ;;  %v946_v46 = vshll.u32 %v1594_v33, 16 }
  0x60   : > { %458 = vrot.lane.b32.xlu0 %v393_v55, %s1926_s21  ;;  %v654_v55 = vshll.u32 %v1567_v14, 16  ;;  %1647 = vmatpush3.bf16.msra.mxu0 %v1229_v48 }
  0x61   : > { %1669 = vmatpush3.bf16.msra.mxu1 %v1229_v48 }
  0x62   : > { %v656_v6 = vrot.slane %v654_v55, 1  ;;  %v1822_v55 = vld [vmem:[%s2031_s10 + $0x38] ss:$0 sps:$4 sm:$0x11]  }
  0x63   : > { %1041 = vrot.lane.b32.xlu1 %v1024_v58, %s1931_s8  ;;  %v697_v58 = vrot.slane %v695_v49, 1  ;;  %v898_v49 = vshll.u32 %v1590_v5, 16  ;;  %v903_v0 = vshll.u32 %v1822_v55, 16 }
  0x64   : > { %1033 = vrot.lane.b32.xlu0 %v1012_v3, %s1931_s8  ;;  %v649_v3 = vrot.slane %v647_v56, 1 }
  0x65   : > { %v698_v13 = vsel %vm357_vm1, %v693_v4, %v697_v58  ;;  %v948_v4 = vrot.slane %v946_v46, 1  ;;  %v896_v58 = vshrl.u32 %v1590_v5, 16 }
  0x66   : > { %v650_v20 = vsel %vm357_vm1, %v645_v59, %v649_v3  ;;  %v900_v59 = vrot.slane %v898_v49, 1  ;;  %v1824_v3 = vld [vmem:[%s2031_s10 + $0x44] ss:$0 sps:$4 sm:$0x11]  }
  0x67   : > { %468 = vrot.lane.b32.xlu1 %v453_v39, %s1926_s21  ;;  %v705_v39 = vor.u32 %v704_v1, %v700_v36  ;;  %v951_v36 = vshll.u32 %v1821_v50, 16  ;;  %v1823_v1 = vld [vmem:[%s2031_s10 + $0x74] ss:$0 sps:$4 sm:$0x11]  }
  0x68   : > { %460 = vrot.lane.b32.xlu0 %v405_v22, %s1926_s21  ;;  %v657_v22 = vor.u32 %v656_v6, %v652_v60  ;;  %v901_v63 = vor.u32 %v900_v59, %v896_v58 }
  0x69   : > { %v953_v7 = vrot.slane %v951_v36, 1 }
  0x6a   : > { %v662_v30 = vsel %vm357_vm1, %v657_v22, %v661_v61  ;;  %v1534_v22 = vld [vmem:[%s2031_s10 + $0x30] sm:$0xe] }
  0x6b   : > { %531 = vrot.lane.b32.xlu1 %v515_v10, %s1925_s20  ;;  %v769_v10 = vrot.slane %v1586_v12, 1 }
  0x6c   : > { %523 = vrot.lane.b32.xlu0 %v503_v26, %s1925_s20  ;;  %v757_v26 = vrot.slane %v1582_v17, 1 }
  0x6d   : > { %v771_v37 = vsel %vm494_vm0, %v769_v10, %v770_v25  ;;  %v1606_v10 = vcombine.low %v1534_v22, %v2386_v11  ;;  %v1539_v25 = vld [vmem:[%s2031_s10 + $0x6c] sm:$0xe] }
  0x6e   : > { %v759_v43 = vsel %vm494_vm0, %v757_v26, %v758_v15  ;;  %v1535_v15 = vld [vmem:[%s2031_s10 + $0x3c] sm:$0xe] }
  0x6f   : > { %533 = vrot.lane.b32.xlu1 %v518_v41, %s1925_s20  ;;  %v1522_v41 = vld [vmem:[%s2031_s10 + $0x6c] sm:$0xf]  ;;  %v1607_v11 = vcombine.low %v1535_v15, %v2402_v45 }
  0x70   : > { %525 = vrot.lane.b32.xlu0 %v506_v9, %s1925_s20  ;;  %v1595_v47 = vcombine.low %v1522_v41, %v2396_v42  ;;  %v1014_v41 = vrot.slane %v1822_v55, 1 }
  0x72   : > { %v958_v56 = vshll.u32 %v1595_v47, 16  ;;  %v956_v6 = vshrl.u32 %v1595_v47, 16 }
  0x73   : > { %587 = vrot.lane.b32.xlu1 %v1570_v21, %s1924_s11  ;;  %v710_v21 = vsel %vm357_vm1, %v705_v39, %v709_v16  ;;  %v1538_v39 = vld [vmem:[%s2031_s10 + $0x60] sm:$0xe]  ;;  %v905_v16 = vrot.slane %v903_v0, 1  ;;  %s175_s10 = sand.u32 1, %s1898_s13  }
  0x74   : > { %579 = vrot.lane.b32.xlu0 %v1566_v29, %s1924_s11  ;;  %v1583_v29 = vcombine.low %v1501_v57, %v2331_v35  ;;  %v773_v35 = vrot.slane %v2352_v53, 1  ;;  %v1591_v53 = vcombine.low %v1514_v44, %v2402_v45  ;;  %v960_v12 = vrot.slane %v958_v56, 1  ;;  %s2566_s9 = scalar_lea.sflag [#allocation3], %s175_s10 }
  0x75   : > { %v1610_v61 = vcombine.low %v1538_v39, %v2379_v27  ;;  %v906_v24 = vsel %vm357_vm1, %v901_v63, %v905_v16  ;;  %v1611_v27 = vcombine.low %v1539_v25, %v2396_v42 }
  0x76   : > { %v760_v9 = vrot.slane %v1583_v29, 1  ;;  %v910_v62 = vshll.u32 %v1591_v53, 16  ;;  %v908_v17 = vshrl.u32 %v1591_v53, 16 }
  0x77   : > { %589 = vrot.lane.b32.xlu1 %v1571_v40, %s1924_s11  ;;  %v772_v40 = vrot.slane %v1587_v8, 1  ;;  %v961_v8 = vor.u32 %v960_v12, %v956_v6  ;;  %v1028_v42 = vrot.slane %v1611_v27, 1 }
  0x78   : > { %581 = vrot.lane.b32.xlu0 %v1567_v14, %s1924_s11  ;;  %v761_v14 = vrot.slane %v2356_v34, 1  ;;  %v944_v34 = vshrl.u32 %v1594_v33, 16  ;;  %v912_v19 = vrot.slane %v910_v62, 1  ;;  %s1932_s11 = smov [#allocation2]  }
  0x79   : > { %v774_v48 = vsel %vm494_vm0, %v772_v40, %v773_v35  ;;  %v1026_v40 = vrot.slane %v1821_v50, 1 }
  0x7a   : > { %v762_v52 = vsel %vm494_vm0, %v760_v9, %v761_v14  ;;  %v949_v60 = vor.u32 %v948_v4, %v944_v34  ;;  %v1029_v14 = vrot.slane %v1823_v1, 1 }
  0x7b   : > { %723 = vrot.lane.b32.xlu1 %v698_v13, %s1927_s24  ;;  %v963_v13 = vshll.u32 %v1823_v1, 16 }
  0x7c   : > { %715 = vrot.lane.b32.xlu0 %v650_v20, %s1927_s24  ;;  %v915_v20 = vshll.u32 %v1824_v3, 16  ;;  %v954_v57 = vsel %vm357_vm1, %v949_v60, %v953_v7  ;;  %v1030_v49 = vsel %vm494_vm0, %v1028_v42, %v1029_v14 }
  0x7e   : > { %v917_v26 = vrot.slane %v915_v20, 1 }
  0x7f   : > { %725 = vrot.lane.b32.xlu1 %v710_v21, %s1927_s24  ;;  %v965_v21 = vrot.slane %v963_v13, 1 }
  0x80   : > { %717 = vrot.lane.b32.xlu0 %v662_v30, %s1927_s24  ;;  %v913_v30 = vor.u32 %v912_v19, %v908_v17  ;;  %s1832_s24 = sshll.u32 %s1932_s11, 4  ;;  %s1833_s24 = int_to_ptr.vmem [resolvable:$false] %s1832_s24 }
  0x82   : > { %v918_v35 = vsel %vm357_vm1, %v913_v30, %v917_v26 }
  0x83   : > { %787 = vrot.lane.b32.xlu1 %v771_v37, %s1928_s27  ;;  %v1025_v37 = vrot.slane %v1610_v61, 1 }
  0x84   : > { %779 = vrot.lane.b32.xlu0 %v759_v43, %s1928_s27 }
  0x85   : > { %v1027_v9 = vsel %vm494_vm0, %v1025_v37, %v1026_v40 }
  0x87   : > { %789 = vrot.lane.b32.xlu1 %v774_v48, %s1928_s27  ;;  %v1017_v48 = vrot.slane %v1824_v3, 1 }
  0x88   : > { %781 = vrot.lane.b32.xlu0 %v762_v52, %s1928_s27  ;;  %s1467_s27 = sshll.u32 %s175_s10, 7 }
  0x89   : > { %s2533_s28 = scalar_lea.vmem [#allocation2], %s1467_s27  ;;  %s1834_s27 = scalar_lea.vmem %s1833_s24, 4096 }
  0x8b   : > { %843 = vrot.lane.b32.xlu1 %v1594_v33, %s1929_s4  ;;  %v966_v33 = vsel %vm357_vm1, %v961_v8, %v965_v21 }
  0x8c   : > { %835 = vrot.lane.b32.xlu0 %v1590_v5, %s1929_s4  ;;  %v1013_v5 = vrot.slane %v1606_v10, 1 }
  0x8e   : > { %v1015_v46 = vsel %vm494_vm0, %v1013_v5, %v1014_v41 }
  0x8f   : > { %845 = vrot.lane.b32.xlu1 %v1595_v47, %s1929_s4  ;;  %v1016_v47 = vrot.slane %v1607_v11, 1 }
  0x90   : > { %837 = vrot.lane.b32.xlu0 %v1591_v53, %s1929_s4  ;;  %s1626_s4 = sshll.u32 %s1910_s16, 5  ;;  %s1376_s16 = sshll.u32 %s2533_s28, 4  ;;  %s2559_s16 = int_to_ptr.vmem [resolvable:$true] %s1376_s16 }
  0x91   : > { %v1018_v50 = vsel %vm494_vm0, %v1016_v47, %v1017_v48  ;;  %s2545_s5 = sadd.s32 %s1626_s4, %s1625_s29  ;;  %s1828_s21 = scalar_lea.vmem %s2559_s16, 2048 }
  0x92   : > { %s1627_s15 = sshll.u32 %s2545_s5, 7  ;;  %p1829_p13 = scmp.ne.s32.totalorder %s2559_s16, %s1828_s21 }
  0x93   : > { %v2427_v29 = vpop.permute.xlu1 %583  ;;  %979 = vrot.lane.b32.xlu1 %v954_v57, %s1930_s7  ;;  %p1835_p2 = scmp.lt.s32.totalorder %s2559_s16, %s1833_s24  ;;  %p1836_p4 = scmp.lt.s32.totalorder %s1834_s27, %s1828_s21 }
  0x94   : > { %v576_v2 = vpop.permute.xlu0 %575  ;;  %971 = vrot.lane.b32.xlu0 %v906_v24, %s1930_s7  ;;  %p1830_p0 = pnand %p1829_p13, %p2005_p3 }
  0x95   : > { %p1837_p5 = por %p1836_p4, %p1835_p2 }
  0x96   : > { %p1831_p1 = pneg %p1830_p0 }
  0x97   : > { %981 = vrot.lane.b32.xlu1 %v966_v33, %s1930_s7 }
  0x98   : > { %v528_v43 = vpop.permute.xlu1 %527  ;;  %973 = vrot.lane.b32.xlu0 %v918_v35, %s1930_s7  ;;  %p1838_p6 = pnand %p1837_p5, %p1831_p1 }
  0x99   : > { %v520_v44 = vpop.permute.xlu0 %519 }
  0x9b   : > { %1043 = vrot.lane.b32.xlu1 %v1027_v9, %s1931_s8 }
  0x9c   : > { %v530_v45 = vpop.permute.xlu1 %529  ;;  %1035 = vrot.lane.b32.xlu0 %v1015_v46, %s1931_s8 }
  0x9e   : > { %v522_v52 = vpop.permute.xlu0 %521 }
  0x9f   : > { %1045 = vrot.lane.b32.xlu1 %v1030_v49, %s1931_s8 }
  0xa0   : > { %1037 = vrot.lane.b32.xlu0 %v1018_v50, %s1931_s8  ;;  %s2555_s8 = scalar_lea.hbm %s2622_s3, %s1627_s15 }
  0xa1   : > { %v457_v53 = vpop.permute.xlu1 %456 }
  0xa2   : > { %v455_v55 = vpop.permute.xlu0 %454 }
  0xa3   : > { %v1049_v16 = vsel %vm1047_vm3, %v2068_v23, %v455_v55 }
  0xa4   : > { %v1066_v22 = vsel %vm1064_vm4, %v1049_v16, %v520_v44 }
  0xa5   : > { %v465_v56 = vpop.permute.xlu1 %464  ;;  %v1083_v8 = vsel %vm1081_vm5, %v1066_v22, %v576_v2  ;;  %v1051_v2 = vsel %vm1047_vm3, %v2081_v38, %v457_v53 }
  0xa6   : > { %v463_v34 = vpop.permute.xlu0 %462  ;;  %v1068_v35 = vsel %vm1064_vm4, %v1051_v2, %v522_v52 }
  0xa7   : > { %v1057_v39 = vsel %vm1047_vm3, %v2063_v18, %v463_v34 }
  0xa8   : > { %v1074_v19 = vsel %vm1064_vm4, %v1057_v39, %v528_v43 }
  0xa9   : > { %v586_v4 = vpop.permute.xlu1 %585  ;;  %v1091_v61 = vsel %vm1081_vm5, %v1074_v19, %v2427_v29  ;;  %v1059_v29 = vsel %vm1047_vm3, %v2075_v31, %v465_v56 }
  0xaa   : > { %v578_v36 = vpop.permute.xlu0 %577  ;;  %v1076_v11 = vsel %vm1064_vm4, %v1059_v29, %v530_v45 }
  0xab   : > { %v1093_v31 = vsel %vm1081_vm5, %v1076_v11, %v586_v4  ;;  %v1085_v38 = vsel %vm1081_vm5, %v1068_v35, %v578_v36 }
  0xad   : > { %v720_v58 = vpop.permute.xlu1 %719 }
  0xae   : > { %v712_v59 = vpop.permute.xlu0 %711  ;;  %v1108_v18 = vsel %vm1098_vm6, %v1091_v61, %v720_v58 }
  0xaf   : > { %v1100_v21 = vsel %vm1098_vm6, %v1083_v8, %v712_v59 }
  0xb1   : > { %v722_v1 = vpop.permute.xlu1 %721 }
  0xb2   : > { %v714_v62 = vpop.permute.xlu0 %713  ;;  %v1110_v41 = vsel %vm1098_vm6, %v1093_v31, %v722_v1 }
  0xb3   : > { %v1102_v9 = vsel %vm1098_vm6, %v1085_v38, %v714_v62 }
  0xb5   : > { %v784_v0 = vpop.permute.xlu1 %783 }
  0xb6   : > { %v776_v3 = vpop.permute.xlu0 %775  ;;  %v1125_v10 = vsel %vm1115_vm7, %v1108_v18, %v784_v0 }
  0xb7   : > { %v1117_v25 = vsel %vm1115_vm7, %v1100_v21, %v776_v3 }
  0xb9   : > { %v786_v60 = vpop.permute.xlu1 %785 }
  0xba   : > { %v778_v6 = vpop.permute.xlu0 %777  ;;  %v1127_v42 = vsel %vm1115_vm7, %v1110_v41, %v786_v60 }
  0xbb   : > { %v1119_v14 = vsel %vm1115_vm7, %v1102_v9, %v778_v6 }
  0xbd   : > { %v840_v7 = vpop.permute.xlu1 %839 }
  0xbe   : > { %v832_v63 = vpop.permute.xlu0 %831  ;;  %v1142_v24 = vsel %vm1132_vm8, %v1125_v10, %v840_v7 }
  0xbf   : > { %v1134_v30 = vsel %vm1132_vm8, %v1117_v25, %v832_v63 }
  0xc1   : > { %v842_v12 = vpop.permute.xlu1 %841 }
  0xc2   : > { %v834_v13 = vpop.permute.xlu0 %833  ;;  %v1144_v44 = vsel %vm1132_vm8, %v1127_v42, %v842_v12 }
  0xc3   : > { %v1136_v46 = vsel %vm1132_vm8, %v1119_v14, %v834_v13 }
  0xc5   : > { %v976_v17 = vpop.permute.xlu1 %975 }
  0xc6   : > { %v968_v20 = vpop.permute.xlu0 %967  ;;  %v1159_v26 = vsel %vm1149_vm9, %v1142_v24, %v976_v17 }
  0xc7   : > { %v1151_v27 = vsel %vm1149_vm9, %v1134_v30, %v968_v20 }
  0xc9   : > { %v978_v57 = vpop.permute.xlu1 %977 }
  0xca   : > { %v970_v23 = vpop.permute.xlu0 %969  ;;  %v1161_v47 = vsel %vm1149_vm9, %v1144_v44, %v978_v57 }
  0xcb   : > { %v1153_v45 = vsel %vm1149_vm9, %v1136_v46, %v970_v23 }
  0xcd   : > { %v1040_v15 = vpop.permute.xlu1 %1039 }
  0xce   : > { %v1032_v33 = vpop.permute.xlu0 %1031  ;;  %v1176_v37 = vsel %vm1166_vm10, %v1159_v26, %v1040_v15 }
  0xcf   : > { %v1168_v40 = vsel %vm1166_vm10, %v1151_v27, %v1032_v33  ;;  %1656 = vmatprep.mubr.msk.bf16.mxu1 %vm1210_vm11, %v1176_v37 }
  0xd0   : > { %1648 = vmatprep.mubr.msk.bf16.mxu0 %vm1210_vm11, %v1168_v40 }
  0xd1   : > { %v467_v5 = vpop.permute.xlu1 %466 }
  0xd2   : > { %v459_v43 = vpop.permute.xlu0 %458  ;;  %v1061_v56 = vsel %vm1047_vm3, %v2219_v51, %v467_v5 }
  0xd3   : > { %v1053_v4 = vsel %vm1047_vm3, %v2222_v54, %v459_v43 }
  0xd5   : > { %v1042_v48 = vpop.permute.xlu1 %1041 }
  0xd6   : > { %v1178_v49 = vsel %vm1166_vm10, %v1161_v47, %v1042_v48  ;;  %v1034_v50 = vpop.permute.xlu0 %1033 }
  0xd7   : > { %v1170_v52 = vsel %vm1166_vm10, %v1153_v45, %v1034_v50  ;;  %1657 = vmatmul.mubr.msk.bf16.vlgmr.msra.gmra.mrb[0].mxu1 %vm1210_vm11, %v1178_v49  ;;  %v1612_v50 = vld [vmem:[%s2621_s2] ss:$0 sm:$0xff] }
  0xd8   : > { %1649 = vmatmul.mubr.msk.bf16.vlgmr.msra.gmra.mrb[0].mxu0 %vm1210_vm11, %v1170_v52 }
  0xd9   : > { %v469_v53 = vpop.permute.xlu1 %468 }
  0xda   : > { %v461_v55 = vpop.permute.xlu0 %460  ;;  %v1063_v1 = vsel %vm1047_vm3, %v2260_v28, %v469_v53 }
  0xdb   : > { %v1055_v0 = vsel %vm1047_vm3, %v2265_v32, %v461_v55 }
  0xdd   : > { %v532_v34 = vpop.permute.xlu1 %531 }
  0xde   : > { %v1078_v36 = vsel %vm1064_vm4, %v1061_v56, %v532_v34  ;;  %v524_v58 = vpop.permute.xlu0 %523 }
  0xdf   : > { %v1070_v59 = vsel %vm1064_vm4, %v1053_v4, %v524_v58 }
  0xe1   : > { %v534_v62 = vpop.permute.xlu1 %533 }
  0xe2   : > { %v1080_v3 = vsel %vm1064_vm4, %v1063_v1, %v534_v62  ;;  %v526_v60 = vpop.permute.xlu0 %525 }
  0xe3   : > { %v1072_v51 = vsel %vm1064_vm4, %v1055_v0, %v526_v60 }
  0xe5   : > { %v588_v6 = vpop.permute.xlu1 %587 }
  0xe6   : > { %v580_v7 = vpop.permute.xlu0 %579  ;;  %v1095_v23 = vsel %vm1081_vm5, %v1078_v36, %v588_v6 }
  0xe7   : > { %v1087_v10 = vsel %vm1081_vm5, %v1070_v59, %v580_v7 }
  0xe9   : > { %v590_v54 = vpop.permute.xlu1 %589 }
  0xea   : > { %v582_v63 = vpop.permute.xlu0 %581  ;;  %v1097_v2 = vsel %vm1081_vm5, %v1080_v3, %v590_v54 }
  0xeb   : > { %v1089_v40 = vsel %vm1081_vm5, %v1072_v51, %v582_v63 }
  0xed   : > { %v724_v12 = vpop.permute.xlu1 %723 }
  0xee   : > { %v716_v13 = vpop.permute.xlu0 %715  ;;  %v1112_v25 = vsel %vm1098_vm6, %v1095_v23, %v724_v12 }
  0xef   : > { %v1104_v29 = vsel %vm1098_vm6, %v1087_v10, %v716_v13 }
  0xf1   : > { %v726_v39 = vpop.permute.xlu1 %725 }
  0xf2   : > { %v718_v16 = vpop.permute.xlu0 %717  ;;  %v1114_v11 = vsel %vm1098_vm6, %v1097_v2, %v726_v39 }
  0xf3   : > { %v1106_v38 = vsel %vm1098_vm6, %v1089_v40, %v718_v16 }
  0xf5   : > { %v788_v17 = vpop.permute.xlu1 %787 }
  0xf6   : > { %v780_v19 = vpop.permute.xlu0 %779  ;;  %v1129_v30 = vsel %vm1115_vm7, %v1112_v25, %v788_v17 }
  0xf7   : > { %v1121_v26 = vsel %vm1115_vm7, %v1104_v29, %v780_v19 }
  0xf9   : > { %v790_v28 = vpop.permute.xlu1 %789 }
  0xfa   : > { %v782_v20 = vpop.permute.xlu0 %781  ;;  %v1131_v41 = vsel %vm1115_vm7, %v1114_v11, %v790_v28 }
  0xfb   : > { %v1123_v9 = vsel %vm1115_vm7, %v1106_v38, %v782_v20 }
  0xfd   : > { %v844_v22 = vpop.permute.xlu1 %843 }
  0xfe   : > { %v836_v61 = vpop.permute.xlu0 %835  ;;  %v1146_v15 = vsel %vm1132_vm8, %v1129_v30, %v844_v22 }
  0xff   : > { %v1138_v27 = vsel %vm1132_vm8, %v1121_v26, %v836_v61 }
 0x101   : > { %v846_v32 = vpop.permute.xlu1 %845 }
 0x102   : > { %v838_v57 = vpop.permute.xlu0 %837  ;;  %v1148_v42 = vsel %vm1132_vm8, %v1131_v41, %v846_v32 }
 0x103   : > { %v1140_v14 = vsel %vm1132_vm8, %v1123_v9, %v838_v57 }
 0x105   : > { %v980_v18 = vpop.permute.xlu1 %979 }
 0x106   : > { %v972_v8 = vpop.permute.xlu0 %971  ;;  %v1163_v33 = vsel %vm1149_vm9, %v1146_v15, %v980_v18 }
 0x107   : > { %v1155_v31 = vsel %vm1149_vm9, %v1138_v27, %v972_v8 }
 0x109   : > { %v982_v21 = vpop.permute.xlu1 %981 }
 0x10a   : > { %v974_v24 = vpop.permute.xlu0 %973  ;;  %v1165_v44 = vsel %vm1149_vm9, %v1148_v42, %v982_v21 }
 0x10b   : > { %v1157_v47 = vsel %vm1149_vm9, %v1140_v14, %v974_v24 }
 0x10d   : > { %v1044_v37 = vpop.permute.xlu1 %1043 }
 0x10e   : > { %v1180_v35 = vsel %vm1166_vm10, %v1163_v33, %v1044_v37  ;;  %v1036_v5 = vpop.permute.xlu0 %1035 }
 0x10f   : > { %v1172_v43 = vsel %vm1166_vm10, %v1155_v31, %v1036_v5  ;;  %1660 = vmatprep.mubr.msk.bf16.mxu1 %vm1210_vm11, %v1180_v35 }
 0x110   : > { %1652 = vmatprep.mubr.msk.bf16.mxu0 %vm1210_vm11, %v1172_v43 }
 0x111   : > { %v1046_v46 = vpop.permute.xlu1 %1045 }
 0x112   : > { %v1182_v48 = vsel %vm1166_vm10, %v1165_v44, %v1046_v46  ;;  %v1038_v45 = vpop.permute.xlu0 %1037 }
 0x113   : > { %v1174_v49 = vsel %vm1166_vm10, %v1157_v47, %v1038_v45  ;;  %1661 = vmatmul.mubr.msk.bf16.gmra.mrb[4].mxu1 %vm1210_vm11, %v1182_v48 }
 0x114   : > { %1653 = vmatmul.mubr.msk.bf16.gmra.mrb[4].mxu0 %vm1210_vm11, %v1174_v49 }
 0x1aa   : > { %v1658_v52 = vpop.f32.mrb[0].mxu1 }
 0x1ab   : > { %v1650_v53 = vpop.f32.mrb[0].mxu0  ;;  %v1306_v55 = vadd.f32 %v1658_v52, %v1612_v50  ;;  %v1297_v56 = vpop.f32.mrb[1].mxu1 }
 0x1ac   : > { %v1274_v34 = vadd.f32 %v1650_v53, %v1612_v50  ;;  %v1265_v4 = vpop.f32.mrb[1].mxu0  ;;  %v1298_v36 = vadd.f32 %v1612_v50, %v1297_v56  ;;  %v1659_v58 = vpop.f32.mrb[2].mxu1 }
 0x1ad   : > { %v1338_v59 = vmax.f32 %v1306_v55, 0.0  ;;  %v1266_v1 = vadd.f32 %v1612_v50, %v1265_v4  ;;  %v1651_v62 = vpop.f32.mrb[2].mxu0  ;;  %v1309_v0 = vadd.f32 %v1659_v58, %v1612_v50  ;;  %v1300_v3 = vpop.f32.mrb[3].mxu1 }
 0x1ae   : > { %v1330_v60 = vmax.f32 %v1274_v34, 0.0  ;;  %v1336_v51 = vmax.f32 %v1298_v36, 0.0  ;;  %v1277_v6 = vadd.f32 %v1651_v62, %v1612_v50  ;;  %v1268_v7 = vpop.f32.mrb[3].mxu0  ;;  %v1301_v54 = vadd.f32 %v1612_v50, %v1300_v3 }
 0x1af   : > { %1354 = vst [vmem:[%s2533_s28 + $0x50] sm:$0xff] %v1338_v59  ;;  %v1328_v63 = vmax.f32 %v1266_v1, 0.0  ;;  %v1339_v12 = vmax.f32 %v1309_v0, 0.0  ;;  %v1269_v13 = vadd.f32 %v1612_v50, %v1268_v7 }
 0x1b0   : > { %1346 = vst [vmem:[%s2533_s28 + $0x10] sm:$0xff] %v1330_v60  ;;  %1352 = vst [vmem:[%s2533_s28 + $0x40] sm:$0xff] %v1336_v51  ;;  %v1331_v39 = vmax.f32 %v1277_v6, 0.0  ;;  %v1337_v16 = vmax.f32 %v1301_v54, 0.0 }
 0x1b1   : > { %1344 = vst [vmem:[%s2533_s28] sm:$0xff] %v1328_v63  ;;  %1355 = vst [vmem:[%s2533_s28 + $0x58] sm:$0xff] %v1339_v12  ;;  %v1329_v17 = vmax.f32 %v1269_v13, 0.0 }
 0x1b2   : > { %1347 = vst [vmem:[%s2533_s28 + $0x18] sm:$0xff] %v1331_v39  ;;  %1353 = vst [vmem:[%s2533_s28 + $0x48] sm:$0xff] %v1337_v16 }
 0x1b3   : > { %1345 = vst [vmem:[%s2533_s28 + $0x8] sm:$0xff] %v1329_v17 }
 0x1e6   : > { %v1662_v19 = vpop.f32.mrb[4].mxu1 }
 0x1e7   : > { %v1654_v28 = vpop.f32.mrb[4].mxu0  ;;  %v1322_v20 = vadd.f32 %v1662_v19, %v1612_v50  ;;  %v1313_v22 = vpop.f32.mrb[5].mxu1 }
 0x1e8   : > { %v1290_v61 = vadd.f32 %v1654_v28, %v1612_v50  ;;  %v1281_v32 = vpop.f32.mrb[5].mxu0  ;;  %v1314_v57 = vadd.f32 %v1612_v50, %v1313_v22  ;;  %v1663_v18 = vpop.f32.mrb[6].mxu1 }
 0x1e9   : > { %v1342_v8 = vmax.f32 %v1322_v20, 0.0  ;;  %v1282_v23 = vadd.f32 %v1612_v50, %v1281_v32  ;;  %v1655_v21 = vpop.f32.mrb[6].mxu0  ;;  %v1325_v10 = vadd.f32 %v1663_v18, %v1612_v50  ;;  %v1316_v25 = vpop.f32.mrb[7].mxu1 }
 0x1ea   : > { %v1334_v24 = vmax.f32 %v1290_v61, 0.0  ;;  %v1340_v29 = vmax.f32 %v1314_v57, 0.0  ;;  %v1293_v30 = vadd.f32 %v1655_v21, %v1612_v50  ;;  %v1284_v26 = vpop.f32.mrb[7].mxu0  ;;  %v1317_v15 = vadd.f32 %v1612_v50, %v1316_v25 }
 0x1eb   : > { %1358 = vst [vmem:[%s2533_s28 + $0x70] sm:$0xff] %v1342_v8  ;;  %v1332_v2 = vmax.f32 %v1282_v23, 0.0  ;;  %v1343_v27 = vmax.f32 %v1325_v10, 0.0  ;;  %v1285_v33 = vadd.f32 %v1612_v50, %v1284_v26 }
 0x1ec   : > { %1350 = vst [vmem:[%s2533_s28 + $0x30] sm:$0xff] %v1334_v24  ;;  %1356 = vst [vmem:[%s2533_s28 + $0x60] sm:$0xff] %v1340_v29  ;;  %v1335_v37 = vmax.f32 %v1293_v30, 0.0  ;;  %v1341_v40 = vmax.f32 %v1317_v15, 0.0 }
 0x1ed   : > { %1348 = vst [vmem:[%s2533_s28 + $0x20] sm:$0xff] %v1332_v2  ;;  %1359 = vst [vmem:[%s2533_s28 + $0x78] sm:$0xff] %v1343_v27  ;;  %v1333_v11 = vmax.f32 %v1285_v33, 0.0 }
 0x1ee   : > { %1351 = vst [vmem:[%s2533_s28 + $0x38] sm:$0xff] %v1335_v37  ;;  %1357 = vst [vmem:[%s2533_s28 + $0x68] sm:$0xff] %v1341_v40 }
 0x1ef   : > { %1349 = vst [vmem:[%s2533_s28 + $0x28] sm:$0xff] %v1333_v11 }
 0x1f0   : > { %1841 = shalt.err (!%p1838_p6)
}
 0x1f1   : > { %s1842_s10 = scalar_lea.hbm %s2555_s8, 2048  ;;  %s1846_s4 = scalar_lea.hbm %s2622_s3, 8192 }
 0x1f2   : > { %p1843_p7 = scmp.ne.s32.totalorder %s2555_s8, %s1842_s10  ;;  %p1847_p11 = scmp.lt.u32.totalorder %s2555_s8, %s2622_s3 }
 0x1f3   : > { %p1848_p12 = scmp.lt.u32.totalorder %s1846_s4, %s1842_s10  ;;  %p1850_p0 = scmp.lt.u32.totalorder %s1842_s10, %s2555_s8 }
 0x1f4   : > { %p1844_p9 = pnand %p1843_p7, %p2005_p3 }
 0x1f5   : > { %p1849_p13 = por %p1848_p12, %p1847_p11 }
 0x1f6   : > { %p1845_p10 = pneg %p1844_p9 }
 0x1f7   : > { %p1851_p1 = por %p1850_p0, %p1849_p13 }
 0x1f9   : > { %p1852_p2 = pnand %p1851_p1, %p1845_p10 }
 0x1fb   : > { %1855 = shalt.err (!%p1852_p2)
}
 0x1fc   : > { %s1933_s6 = smov 128  }
 0x1fd   : > { %1673 = dma.vmem_to_hbm [thread:$0]  (%p2005_p3), %s2559_s16, 2048, %s2555_s8, %s2566_s9, %s1933_s6, %s1933_s6, %s1925_s20  }
 0x1fe PF: > { %p1679_p4 = scmp.ge.s32.totalorder %s1922_s19, 2  ;;  %s1391_s7 = sand.u32 1, %s1894_s12  }
 0x1ff   : > { %s1392_s21 = scalar_lea.sflag [#allocation3], %s1391_s7 }
 0x200   : > { %p1676_p5 = pnand %p1679_p4, %p2014_p8 }
 0x202   : > { %1889 = dma.done.wait (!%p1676_p5), %s1392_s21, 2048  }
 0x203   : > { %1891 = vsyncadd (!%p1676_p5), %s1392_s21, 4294965248  ;;  %s16_s19 = sadd.s32 1, %s1922_s19   ;;  %s2625_s12 = smov %s1898_s13 }
 0x204   : > { %p13_p6 = scmp.ge.s32.totalorder %s16_s19, 6   ;;  %s2626_s13 = smov %s1902_s14 }
 0x205   : > { %s2627_s14 = smov %s2023_s30  ;;  %s2628_s15 = smov %s1914_s17 }
 0x206   : > { %s2629_s16 = smov %s1918_s18  ;;  %s2630_s17 = smov %s2633_s22 }
 0x207   : > { %s2631_s18 = smov %s2637_s23  ;;  %15 = sbr.rel (!%p13_p6) target bundleno = 5 (0x5), region = 70 }
 0x20e   :  { %1397 = vsyncpa [#allocation3], 1 }
 0x20f   :  { %1399 = vsyncpa [#allocation3 + $0x1], 1 }

</bundles_post_ra>
